<compile_context>
chip_gen: v7x
topology: tpu7x:2x2x1
jax: 0.10.0
libtpu: 0.0.40
codegen_flags: <defaults>
</compile_context>

<pallas_src>
import jax
import jax.numpy as jnp
from jax import lax
from jax.experimental import pallas as pl
from jax.experimental.pallas import tpu as pltpu


def gmapad_encode_kernel(kmap_ref, mask_ref, xw1_ref, a_ref, pa_ref, b1_ref,
                         w2_ref, out_ref, h1_acc):
    """One (row-tile i, K-tile k) step of the fused two-layer GCN + pooling."""
    i = pl.program_id(0)
    k = pl.program_id(1)
    nk = pl.num_programs(1)

    @pl.when(k == 0)
    def _():
        h1_acc[...] = jnp.zeros_like(h1_acc)

    # Skip all-zero adjacency blocks entirely (their DMA is also elided because
    # the index_map points them at the previously fetched nonzero block).
    @pl.when(mask_ref[i * nk + k] != 0)
    def _():
        # Layer-1 partial: h1_acc += A[i, k] @ XW1[k]   (bf16 in, f32 acc)
        h1_acc[...] += jnp.dot(a_ref[...], xw1_ref[...],
                               preferred_element_type=jnp.float32)

    @pl.when(k == nk - 1)
    def _():
        # Finish layer 1 for this row tile and fold straight into pooling:
        #   g_partial[i] = P_A[:, rows_i] @ (ReLU(h1_i + b1) @ W2)
        h1 = jnp.maximum(h1_acc[...] + b1_ref[...], 0.0)           # [tm, H] f32
        # Dropout(p=0.5) is identity in eval mode (inference path).
        hw2 = jnp.dot(h1.astype(jnp.bfloat16), w2_ref[...],
                      preferred_element_type=jnp.float32)          # [tm, D] f32
        part = jnp.dot(pa_ref[...], hw2.astype(jnp.bfloat16),
                       preferred_element_type=jnp.float32)         # [G, D] f32
        out_ref[...] = part[None]                                  # [1, G, D]


def gmapad_distance_kernel(g_ref, b2_ref, cand_ref, out_ref):
    """Tiny epilogue: bias on G rows + per-candidate Euclidean distance."""
    g = g_ref[...] + b2_ref[...]                                   # [G, D]
    diff = g[:, None, :] - cand_ref[...][None, :, :]               # [G, C, D]
    out_ref[...] = jnp.sqrt(jnp.sum(diff * diff, axis=-1))         # [G, C]


def _round_up(n, m):
    return ((n + m - 1) // m) * m


def gmapad_forward(x, a_hat, w1, b1, w2, b2, pool, candidates, *, tile_target=512):
    N, _ = x.shape
    H = w1.shape[1]
    D = w2.shape[1]
    G = pool.shape[0]
    C = candidates.shape[0]

    # ---- wrapper-side (glue) precomputation --------------------------------
    # Layer-1 feature transform once (previously recomputed per row tile).
    xw1 = jnp.dot(x, w1)                                           # [N, H]
    # Fuse global_mean_pool into the 2nd propagation:
    #   g = pool @ A_hat @ (h1 @ W2) = (pool @ A_hat) @ (h1 @ W2)
    pa = jnp.dot(pool, a_hat)                                      # [G, N]

    # Zero-pad N up to a multiple of the tile size: keeps big-tile streaming
    # for arbitrary N (padded nodes have zero adjacency and zero pool weight,
    # so they contribute nothing).
    tile = tile_target if N > tile_target else _round_up(N, 128)
    n_pad = _round_up(N, tile)
    tm = tk = tile
    ni, nk = n_pad // tm, n_pad // tk

    a_pad = jnp.zeros((n_pad, n_pad), a_hat.dtype).at[:N, :N].set(a_hat)
    xw1_pad = jnp.zeros((n_pad, H), xw1.dtype).at[:N].set(xw1)
    pa_pad = jnp.zeros((G, n_pad), pa.dtype).at[:, :N].set(pa)

    # Block-sparsity metadata (scalar prefetch -> SMEM): nonzero flag per
    # (i, k) adjacency block, plus a redirected k index that repeats the last
    # fetched nonzero block so zero blocks are neither DMA'd nor multiplied.
    blk_nz = jnp.any(a_pad.reshape(ni, tm, nk, tk) != 0.0, axis=(1, 3))  # [ni, nk]

    def _redirect(prev, inp):
        k_idx, nz = inp
        cur = jnp.where(nz, k_idx, prev)
        return cur, cur

    _, kmap_t = lax.scan(_redirect, jnp.zeros((ni,), jnp.int32),
                         (jnp.arange(nk, dtype=jnp.int32), blk_nz.T))
    kmap = kmap_t.T.reshape(ni * nk).astype(jnp.int32)             # [ni*nk]
    mask = blk_nz.reshape(ni * nk).astype(jnp.int32)               # [ni*nk]

    # bf16 MXU operands (f32 accumulation inside the kernel); biases and
    # candidates stay f32 for the elementwise / distance math.
    a_b = a_pad.astype(jnp.bfloat16)
    xw1_b = xw1_pad.astype(jnp.bfloat16)
    pa_b = pa_pad.astype(jnp.bfloat16)
    w2_b = w2.astype(jnp.bfloat16)

    grid_spec = pltpu.PrefetchScalarGridSpec(
        num_scalar_prefetch=2,
        grid=(ni, nk),
        in_specs=[
            pl.BlockSpec((tk, H), lambda i, k, km, mk: (km[i * nk + k], 0)),   # XW1
            pl.BlockSpec((tm, tk), lambda i, k, km, mk: (i, km[i * nk + k])),  # A_hat
            pl.BlockSpec((G, tm), lambda i, k, km, mk: (0, i)),                # P_A cols
            pl.BlockSpec((1, H), lambda i, k, km, mk: (0, 0)),                 # b1
            pl.BlockSpec((H, D), lambda i, k, km, mk: (0, 0)),                 # W2
        ],
        out_specs=pl.BlockSpec((1, G, D), lambda i, k, km, mk: (i, 0, 0)),
        scratch_shapes=[pltpu.VMEM((tm, H), jnp.float32)],          # h1 accumulator
    )

    # Generation-aware VMEM budget (64 MiB/TC on v7x, 128 MiB on v5e/v6e).
    try:
        vmem_cap = int(pltpu.get_tpu_info().vmem_capacity_bytes)
    except Exception:
        vmem_cap = 64 << 20                                        # conservative
    need = (2 * 2 * (tm * tk + tk * H + G * tm)        # double-buffered bf16 streams
            + 2 * (2 * H * D + 4 * H)                  # resident W2 (bf16) + b1 (f32)
            + 2 * 4 * G * D                            # output block (f32)
            + 4 * tm * H)                              # h1 accumulator (f32)
    vmem_limit = int(min(max(2 * need, 8 << 20), (vmem_cap * 3) // 4))

    flops = 2 * n_pad * n_pad * H + 2 * n_pad * H * D + 2 * G * n_pad * D
    bytes_accessed = (2 * n_pad * n_pad + 2 * ni * n_pad * H + 2 * G * n_pad
                      + 2 * H * D + 4 * H + 4 * ni * G * D)

    g_parts = pl.pallas_call(
        gmapad_encode_kernel,
        out_shape=jax.ShapeDtypeStruct((ni, G, D), jnp.float32),
        grid_spec=grid_spec,
        compiler_params=pltpu.CompilerParams(
            # Row tiles produce independent partial g's -> the i axis can be
            # split across v7x's two TensorCores; k carries h1_acc.
            dimension_semantics=("parallel", "arbitrary"),
            vmem_limit_bytes=vmem_limit,
        ),
        cost_estimate=pl.CostEstimate(flops=flops, transcendentals=0,
                                      bytes_accessed=bytes_accessed),
    )(kmap, mask, xw1_b, a_b, pa_b, b1, w2_b)

    # Trivial [G, D] reduction over per-row-tile partials (glue).
    g_sum = jnp.sum(g_parts, axis=0)

    # Tiny second kernel: b2 + Euclidean distance to every candidate.
    dist = pl.pallas_call(
        gmapad_distance_kernel,
        out_shape=jax.ShapeDtypeStruct((G, C), jnp.float32),
    )(g_sum, b2, candidates)

    # torch.stack(sims, dim=1) of per-candidate [G, 1] tensors -> [G, C, 1]
    return dist[:, :, None]


if __name__ == "__main__":
    key = jax.random.PRNGKey(0)
    N, F_in, F_hid, F_out = 32, 16, 32, 64      # nodes, input/hidden/output dim
    G = 4                                       # number of graphs
    C = 8                                       # number of candidate nodes
    per = N // G

    k_x, k_w1, k_w2, k_c = jax.random.split(key, 4)
    x = jax.random.normal(k_x, (N, F_in), dtype=jnp.float32)
    batch = jnp.repeat(jnp.arange(G, dtype=jnp.int32), per)        # [N]

    # Undirected ring edges inside each graph (glue: builds edge_index).
    src, dst = [], []
    for g in range(G):
        for n in range(per):
            u = g * per + n
            v = g * per + (n + 1) % per
            src += [u, v]
            dst += [v, u]
    edge_index = jnp.array([src, dst], dtype=jnp.int32)            # [2, 64]

    # GCNConv normalization glue: A_hat = D^{-1/2} (A + I) D^{-1/2}.
    A = jnp.zeros((N, N), jnp.float32).at[edge_index[0], edge_index[1]].set(1.0)
    A = A + jnp.eye(N, dtype=jnp.float32)
    deg = A.sum(axis=1)
    dinv = lax.rsqrt(deg)
    a_hat = dinv[:, None] * A * dinv[None, :]

    # PyG GCNConv-style params: glorot-style weight, zero bias.
    w1 = jax.random.normal(k_w1, (F_in, F_hid), jnp.float32) * (1.0 / jnp.sqrt(F_in))
    b1 = jnp.zeros((1, F_hid), jnp.float32)
    w2 = jax.random.normal(k_w2, (F_hid, F_out), jnp.float32) * (1.0 / jnp.sqrt(F_hid))
    b2 = jnp.zeros((1, F_out), jnp.float32)

    # global_mean_pool as a [G, N] averaging matrix (glue).
    onehot = (batch[None, :] == jnp.arange(G, dtype=jnp.int32)[:, None]).astype(jnp.float32)
    pool = onehot / jnp.maximum(onehot.sum(axis=1, keepdims=True), 1.0)

    # self.optimized_candidates stand-in (deterministic synthetic embeddings).
    # TODO(synk): differential_evolution / get_initial_candidates are host-side
    # stochastic training-time optimizers (np.random, topk over growing sets)
    # with no clean Pallas equivalent; the inference path only needs the stored
    # candidate embeddings.
    candidates = jax.random.normal(k_c, (C, F_out), jnp.float32)

    sims = gmapad_forward(x, a_hat, w1, b1, w2, b2, pool, candidates)
    sims = jax.block_until_ready(sims)

    # Pure-JAX f32 reference of the eval-mode forward (tolerance check, since
    # the kernel uses bf16 MXU operands).
    h1_ref = jnp.maximum(a_hat @ (x @ w1) + b1, 0.0)
    h2_ref = a_hat @ (h1_ref @ w2) + b2
    g_ref = pool @ h2_ref
    d_ref = jnp.sqrt(((g_ref[:, None, :] - candidates[None, :, :]) ** 2).sum(-1))

    assert sims.shape == (G, C, 1) and sims.dtype == jnp.float32
    assert bool(jnp.allclose(sims[:, :, 0], d_ref, rtol=0.1, atol=0.1)), (
        float(jnp.max(jnp.abs(sims[:, :, 0] - d_ref))))
    print("KERNEL_OK")
</pallas_src>

<mosaic_0001>
module attributes {stable_mosaic.version = 11 : i64} {
  func.func @gmapad_encode_kernel(%arg0: i32, %arg1: i32, %arg2: memref<1xi32, #tpu.memory_space<smem>>, %arg3: memref<1xi32, #tpu.memory_space<smem>>, %arg4: memref<128x32xbf16, #tpu.memory_space<vmem>>, %arg5: memref<128x128xbf16, #tpu.memory_space<vmem>>, %arg6: memref<4x128xbf16, #tpu.memory_space<vmem>>, %arg7: memref<1x32xf32, #tpu.memory_space<vmem>>, %arg8: memref<32x64xbf16, #tpu.memory_space<vmem>>, %arg9: memref<1x4x64xf32, #tpu.memory_space<vmem>>, %arg10: memref<128x32xf32, #tpu.memory_space<vmem>>) attributes {dimension_semantics = [#tpu.dimension_semantics<parallel>, #tpu.dimension_semantics<arbitrary>], iteration_bounds = array<i64: 1, 1>, scalar_prefetch = 2 : i64, scratch_operands = 1 : i64, tpu.core_type = #tpu.core_type<tc>, window_params = [{transform_indices = @transform_0, window_bounds = array<i64: 128, 32>}, {transform_indices = @transform_1, window_bounds = array<i64: 128, 128>}, {transform_indices = @transform_2, window_bounds = array<i64: 4, 128>}, {pipeline_mode = #tpu.pipeline_mode<synchronous>, transform_indices = @transform_3, window_bounds = array<i64: 1, 32>}, {pipeline_mode = #tpu.pipeline_mode<synchronous>, transform_indices = @transform_4, window_bounds = array<i64: 32, 64>}, {transform_indices = @transform_5, window_bounds = array<i64: 1, 4, 64>}]} {
    %c0_i32 = arith.constant 0 : i32
    %0 = arith.cmpi eq, %arg1, %c0_i32 : i32
    %1 = arith.extui %0 : i1 to i32
    %c0_i32_0 = arith.constant 0 : i32
    %2 = arith.cmpi ne, %1, %c0_i32_0 : i32
    scf.if %2 {
      %cst = arith.constant 0.000000e+00 : f32
      %13 = vector.broadcast %cst : f32 to vector<128x32xf32>
      %c0 = arith.constant 0 : index
      %c0_5 = arith.constant 0 : index
      %14 = vector.load %arg10[%c0, %c0_5] : memref<128x32xf32, #tpu.memory_space<vmem>>, vector<128x32xf32>
      tpu.vector_store %arg10[%c0, %c0_5], %13 {strides = array<i32>} : memref<128x32xf32, #tpu.memory_space<vmem>>, vector<128x32xf32>,
    } else {
    }
    %c1_i32 = arith.constant 1 : i32
    %3 = arith.muli %arg0, %c1_i32 : i32
    %4 = arith.addi %3, %arg1 : i32
    %5 = arith.index_cast %4 : i32 to index
    %6 = memref.load %arg3[%5] : memref<1xi32, #tpu.memory_space<smem>>
    %c0_i32_1 = arith.constant 0 : i32
    %7 = arith.cmpi ne, %6, %c0_i32_1 : i32
    %8 = arith.extui %7 : i1 to i32
    %c0_i32_2 = arith.constant 0 : i32
    %9 = arith.cmpi ne, %8, %c0_i32_2 : i32
    scf.if %9 {
      %c0 = arith.constant 0 : index
      %c0_5 = arith.constant 0 : index
      %13 = vector.load %arg10[%c0, %c0_5] : memref<128x32xf32, #tpu.memory_space<vmem>>, vector<128x32xf32>
      %c0_6 = arith.constant 0 : index
      %c0_7 = arith.constant 0 : index
      %14 = vector.load %arg5[%c0_6, %c0_7] : memref<128x128xbf16, #tpu.memory_space<vmem>>, vector<128x128xbf16>
      %c0_8 = arith.constant 0 : index
      %c0_9 = arith.constant 0 : index
      %15 = vector.load %arg4[%c0_8, %c0_9] : memref<128x32xbf16, #tpu.memory_space<vmem>>, vector<128x32xbf16>
      %cst = arith.constant dense<0.000000e+00> : vector<128x32xf32>
      %16 = tpu.matmul %14, %15, %cst {dimension_numbers = #tpu.dot_dimension_numbers<[1], [0], [0], [1], [0, 0, 1, 1], [], []>} : vector<128x128xbf16>, vector<128x32xbf16>, vector<128x32xf32> -> vector<128x32xf32>
      %17 = arith.addf %13, %16 : vector<128x32xf32>
      %c0_10 = arith.constant 0 : index
      %c0_11 = arith.constant 0 : index
      %18 = vector.load %arg10[%c0_10, %c0_11] : memref<128x32xf32, #tpu.memory_space<vmem>>, vector<128x32xf32>
      tpu.vector_store %arg10[%c0_10, %c0_11], %17 {strides = array<i32>} : memref<128x32xf32, #tpu.memory_space<vmem>>, vector<128x32xf32>,
    } else {
    }
    %c0_i32_3 = arith.constant 0 : i32
    %10 = arith.cmpi eq, %arg1, %c0_i32_3 : i32
    %11 = arith.extui %10 : i1 to i32
    %c0_i32_4 = arith.constant 0 : i32
    %12 = arith.cmpi ne, %11, %c0_i32_4 : i32
    scf.if %12 {
      %c0 = arith.constant 0 : index
      %c0_5 = arith.constant 0 : index
      %13 = vector.load %arg10[%c0, %c0_5] : memref<128x32xf32, #tpu.memory_space<vmem>>, vector<128x32xf32>
      %c0_6 = arith.constant 0 : index
      %c0_7 = arith.constant 0 : index
      %14 = vector.load %arg7[%c0_6, %c0_7] : memref<1x32xf32, #tpu.memory_space<vmem>>, vector<1x32xf32>
      %15 = vector.broadcast %14 : vector<1x32xf32> to vector<128x32xf32>
      %16 = arith.addf %13, %15 : vector<128x32xf32>
      %cst = arith.constant 0.000000e+00 : f32
      %17 = vector.broadcast %cst : f32 to vector<128x32xf32>
      %18 = arith.maximumf %16, %17 : vector<128x32xf32>
      %19 = arith.truncf %18 : vector<128x32xf32> to vector<128x32xbf16>
      %c0_8 = arith.constant 0 : index
      %c0_9 = arith.constant 0 : index
      %20 = vector.load %arg8[%c0_8, %c0_9] : memref<32x64xbf16, #tpu.memory_space<vmem>>, vector<32x64xbf16>
      %cst_10 = arith.constant dense<0.000000e+00> : vector<128x64xf32>
      %21 = tpu.matmul %19, %20, %cst_10 {dimension_numbers = #tpu.dot_dimension_numbers<[1], [0], [0], [1], [0, 0, 1, 1], [], []>} : vector<128x32xbf16>, vector<32x64xbf16>, vector<128x64xf32> -> vector<128x64xf32>
      %c0_11 = arith.constant 0 : index
      %c0_12 = arith.constant 0 : index
      %22 = vector.load %arg6[%c0_11, %c0_12] : memref<4x128xbf16, #tpu.memory_space<vmem>>, vector<4x128xbf16>
      %23 = arith.truncf %21 : vector<128x64xf32> to vector<128x64xbf16>
      %cst_13 = arith.constant dense<0.000000e+00> : vector<4x64xf32>
      %24 = tpu.matmul %22, %23, %cst_13 {dimension_numbers = #tpu.dot_dimension_numbers<[1], [0], [0], [1], [0, 0, 1, 1], [], []>} : vector<4x128xbf16>, vector<128x64xbf16>, vector<4x64xf32> -> vector<4x64xf32>
      %25 = vector.shape_cast %24 : vector<4x64xf32> to vector<1x4x64xf32>
      %c0_14 = arith.constant 0 : index
      %c0_15 = arith.constant 0 : index
      %c0_16 = arith.constant 0 : index
      %26 = vector.load %arg9[%c0_14, %c0_15, %c0_16] : memref<1x4x64xf32, #tpu.memory_space<vmem>>, vector<1x4x64xf32>
      tpu.vector_store %arg9[%c0_14, %c0_15, %c0_16], %25 {strides = array<i32>} : memref<1x4x64xf32, #tpu.memory_space<vmem>>, vector<1x4x64xf32>,
    } else {
    }
    return
  }
  func.func @transform_0(%arg0: i32, %arg1: i32, %arg2: memref<1xi32, #tpu.memory_space<smem>>, %arg3: memref<1xi32, #tpu.memory_space<smem>>) -> (i32, i32) {
    %c1_i32 = arith.constant 1 : i32
    %0 = arith.muli %arg0, %c1_i32 : i32
    %1 = arith.addi %0, %arg1 : i32
    %2 = arith.index_cast %1 : i32 to index
    %3 = memref.load %arg2[%2] : memref<1xi32, #tpu.memory_space<smem>>
    %c0_i32 = arith.constant 0 : i32
    %c0_i32_0 = arith.constant 0 : i32
    return %3, %c0_i32 : i32, i32
  }
  func.func @transform_1(%arg0: i32, %arg1: i32, %arg2: memref<1xi32, #tpu.memory_space<smem>>, %arg3: memref<1xi32, #tpu.memory_space<smem>>) -> (i32, i32) {
    %c1_i32 = arith.constant 1 : i32
    %0 = arith.muli %arg0, %c1_i32 : i32
    %1 = arith.addi %0, %arg1 : i32
    %2 = arith.index_cast %1 : i32 to index
    %3 = memref.load %arg2[%2] : memref<1xi32, #tpu.memory_space<smem>>
    %c0_i32 = arith.constant 0 : i32
    return %arg0, %3 : i32, i32
  }
  func.func @transform_2(%arg0: i32, %arg1: i32, %arg2: memref<1xi32, #tpu.memory_space<smem>>, %arg3: memref<1xi32, #tpu.memory_space<smem>>) -> (i32, i32) {
    %c0_i32 = arith.constant 0 : i32
    %c0_i32_0 = arith.constant 0 : i32
    return %c0_i32, %arg0 : i32, i32
  }
  func.func @transform_3(%arg0: i32, %arg1: i32, %arg2: memref<1xi32, #tpu.memory_space<smem>>, %arg3: memref<1xi32, #tpu.memory_space<smem>>) -> (i32, i32) {
    %c0_i32 = arith.constant 0 : i32
    %c0_i32_0 = arith.constant 0 : i32
    %c0_i32_1 = arith.constant 0 : i32
    return %c0_i32, %c0_i32_0 : i32, i32
  }
  func.func @transform_4(%arg0: i32, %arg1: i32, %arg2: memref<1xi32, #tpu.memory_space<smem>>, %arg3: memref<1xi32, #tpu.memory_space<smem>>) -> (i32, i32) {
    %c0_i32 = arith.constant 0 : i32
    %c0_i32_0 = arith.constant 0 : i32
    %c0_i32_1 = arith.constant 0 : i32
    return %c0_i32, %c0_i32_0 : i32, i32
  }
  func.func @transform_5(%arg0: i32, %arg1: i32, %arg2: memref<1xi32, #tpu.memory_space<smem>>, %arg3: memref<1xi32, #tpu.memory_space<smem>>) -> (i32, i32, i32) {
    %c0_i32 = arith.constant 0 : i32
    %c0_i32_0 = arith.constant 0 : i32
    %c0_i32_1 = arith.constant 0 : i32
    return %arg0, %c0_i32, %c0_i32_0 : i32, i32, i32
  }
}

</mosaic_0001>

<bundles_post_ra>
// kernel: tpu_custom_call.1
= control target key start
LH: loop header
LB: loop body
LE: loop exit
PB: predicated region body
PF: predicated region fallthrough
CT: control target
= control target key end

     0   :  { %14 = vsyncpa [#allocation7], 0  ;;  %vm79_vm0 = vcmask 261120   ;;  %v856_v0 = vmov 0.0   ;;  %s1036_s0 = inlined_call_operand.<no memory space> [shape: s32[1], index: 0, kind: input, shape index: {}]   ;;  %s1037_s1 = inlined_call_operand.<no memory space> [shape: s32[1], index: 1, kind: input, shape index: {}]   ;;  %s1038_s2 = inlined_call_operand.vmem [shape: bf16[128,32], index: 2, kind: input, shape index: {}]   ;;  %s1039_s3 = inlined_call_operand.vmem [shape: bf16[128,128], index: 3, kind: input, shape index: {}]   ;;  %s1040_s4 = inlined_call_operand.vmem [shape: bf16[4,128], index: 4, kind: input, shape index: {}]   ;;  %s1041_s5 = inlined_call_operand.vmem [shape: f32[1,32], index: 5, kind: input, shape index: {}]   ;;  %s1042_s6 = inlined_call_operand.vmem [shape: bf16[32,64], index: 6, kind: input, shape index: {}]   ;;  %s1043_s7 = inlined_call_operand.hbm [shape: f32[1,4,64], index: 7, kind: output, shape index: {}]  }
   0x1   :  { %s657_s26 = sshll.u32 %s1036_s0, 4  ;;  %p68_p0 = scmp.lt.s32.totalorder %s1036_s0, 0  ;;  %80 = vst.msk [vmem:[#allocation2] sm:$0xff] %vm79_vm0, %v856_v0  ;;  %81 = vst.msk [vmem:[#allocation2 + $0x8] sm:$0xff] %vm79_vm0, %v856_v0 }
   0x2   :  { %p905_p1 = scmp.lt.s32.totalorder %s657_s26, 15  ;;  %82 = vst.msk [vmem:[#allocation2 + $0x10] sm:$0xff] %vm79_vm0, %v856_v0  ;;  %83 = vst.msk [vmem:[#allocation2 + $0x18] sm:$0xff] %vm79_vm0, %v856_v0  ;;  %p660_p2 = scmp.eq.s32.totalorder %s1037_s1, 0 }
   0x3   :  { %84 = vst.msk [vmem:[#allocation2 + $0x20] sm:$0xff] %vm79_vm0, %v856_v0  ;;  %85 = vst.msk [vmem:[#allocation2 + $0x28] sm:$0xff] %vm79_vm0, %v856_v0  ;;  %s1046_s0 = smov (!%p68_p0, %s1036_s0), 0 }
   0x4   :  { %86 = vst.msk [vmem:[#allocation2 + $0x30] sm:$0xff] %vm79_vm0, %v856_v0  ;;  %87 = vst.msk [vmem:[#allocation2 + $0x38] sm:$0xff] %vm79_vm0, %v856_v0  ;;  %s1048_s26 = smov (!%p905_p1, %s657_s26), 15  ;;  %s659_s11 = sshll.u32 %s1046_s0, 2 }
   0x5   :  { %88 = vst.msk [vmem:[#allocation2 + $0x40] sm:$0xff] %vm79_vm0, %v856_v0  ;;  %89 = vst.msk [vmem:[#allocation2 + $0x48] sm:$0xff] %vm79_vm0, %v856_v0  ;;  %s658_s12 = sshll.u32 %s1048_s26, 2  ;;  %s953_s15 = scalar_lea.vmem %s1039_s3, %s659_s11 }
   0x6   :  { %90 = vst.msk [vmem:[#allocation2 + $0x50] sm:$0xff] %vm79_vm0, %v856_v0  ;;  %91 = vst.msk [vmem:[#allocation2 + $0x58] sm:$0xff] %vm79_vm0, %v856_v0  ;;  %s958_s18 = scalar_lea.vmem %s1038_s2, %s658_s12  ;;  %101 = sbr.rel (%p660_p2) target bundleno = 266 (0x10a), region = 29  ;;  %v822_v5 = vld [vmem:[%s953_s15] sm:$0xff] (!%p660_p2)   ;;  %v824_v11 = vld [vmem:[%s953_s15 + $0x8] sm:$0xff] (!%p660_p2)  }
   0x7   :  { %92 = vst.msk [vmem:[#allocation2 + $0x60] sm:$0xff] %vm79_vm0, %v856_v0  ;;  %93 = vst.msk [vmem:[#allocation2 + $0x68] sm:$0xff] %vm79_vm0, %v856_v0  ;;  %v814_v1 = vld [vmem:[%s958_s18] sm:$0xff] (!%p660_p2)   ;;  %v815_v2 = vld [vmem:[%s958_s18 + $0x8] sm:$0xff] (!%p660_p2)   ;;  %739 = vmatprep.mubr.bf16.mxu0 (!%p660_p2), %v822_v5 }
   0x8   :  { %94 = vst.msk [vmem:[#allocation2 + $0x70] sm:$0xff] %vm79_vm0, %v856_v0  ;;  %95 = vst.msk [vmem:[#allocation2 + $0x78] sm:$0xff] %vm79_vm0, %v856_v0  ;;  %723 = vmatprep.subr.bf16.mxu0 (!%p660_p2), %v814_v1  ;;  %795 = vmatprep.subr.bf16.mxu1 (!%p660_p2), %v814_v1  ;;  %v816_v3 = vld [vmem:[%s958_s18 + $0x10] sm:$0xff] (!%p660_p2)   ;;  %v817_v4 = vld [vmem:[%s958_s18 + $0x18] sm:$0xff] (!%p660_p2)  }
   0x9   :  { %724 = vmatpush3.bf16.msra.mxu0 (!%p660_p2), %v814_v1  ;;  %803 = vmatpush3.bf16.msra.mxu1 (!%p660_p2), %v814_v1  ;;  %v823_v6 = vld [vmem:[%s953_s15 + $0x20] sm:$0xff] (!%p660_p2)   ;;  %v819_v8 = vld [vmem:[%s958_s18 + $0x28] sm:$0xff] (!%p660_p2)   ;;  %v820_v9 = vld [vmem:[%s958_s18 + $0x30] sm:$0xff] (!%p660_p2)  }
   0xa   :  { %725 = vmatprep.subr.bf16.mxu0 (!%p660_p2), %v815_v2  ;;  %796 = vmatprep.subr.bf16.mxu1 (!%p660_p2), %v815_v2  ;;  %v818_v7 = vld [vmem:[%s958_s18 + $0x20] sm:$0xff] (!%p660_p2)   ;;  %v821_v10 = vld [vmem:[%s958_s18 + $0x38] sm:$0xff] (!%p660_p2)   ;;  %v825_v12 = vld [vmem:[%s953_s15 + $0x28] sm:$0xff] (!%p660_p2)  }
   0xb   :  { %747 = vmatprep.mubr.bf16.mxu1 (!%p660_p2), %v823_v6  ;;  %v826_v13 = vld [vmem:[%s953_s15 + $0x10] sm:$0xff] (!%p660_p2)   ;;  %v828_v15 = vld [vmem:[%s953_s15 + $0x18] sm:$0xff] (!%p660_p2)   ;;  %v102_v19 = vld [vmem:[#allocation2] sm:$0xff] (!%p660_p2) }
   0xc   :  { %v827_v14 = vld [vmem:[%s953_s15 + $0x30] sm:$0xff] (!%p660_p2)   ;;  %v829_v16 = vld [vmem:[%s953_s15 + $0x38] sm:$0xff] (!%p660_p2)   ;;  %v110_v20 = vld [vmem:[#allocation2 + $0x40] sm:$0xff] (!%p660_p2) }
   0xd   :  { %726 = vmatpush3.bf16.msra.mxu0 %v815_v2  ;;  %804 = vmatpush3.bf16.msra.mxu1 %v815_v2  ;;  %v104_v17 = vld [vmem:[#allocation2 + $0x10] sm:$0xff]  ;;  %v105_v23 = vld [vmem:[#allocation2 + $0x18] sm:$0xff]  ;;  %v103_v29 = vld [vmem:[#allocation2 + $0x8] sm:$0xff] }
   0xe   :  { %727 = vmatprep.subr.bf16.mxu0 %v816_v3  ;;  %797 = vmatprep.subr.bf16.mxu1 %v816_v3  ;;  %v112_v18 = vld [vmem:[#allocation2 + $0x50] sm:$0xff]  ;;  %v113_v24 = vld [vmem:[#allocation2 + $0x58] sm:$0xff]  ;;  %v111_v30 = vld [vmem:[#allocation2 + $0x48] sm:$0xff] }
   0xf   :  { %v108_v41 = vld [vmem:[#allocation2 + $0x30] sm:$0xff]  ;;  %v106_v43 = vld [vmem:[#allocation2 + $0x20] sm:$0xff]  ;;  %v109_v47 = vld [vmem:[#allocation2 + $0x38] sm:$0xff] }
  0x10   :  { %v116_v42 = vld [vmem:[#allocation2 + $0x70] sm:$0xff]  ;;  %v114_v44 = vld [vmem:[#allocation2 + $0x60] sm:$0xff]  ;;  %v117_v48 = vld [vmem:[#allocation2 + $0x78] sm:$0xff] }
  0x11   :  { %728 = vmatpush3.bf16.msra.mxu0 %v816_v3  ;;  %805 = vmatpush3.bf16.msra.mxu1 %v816_v3  ;;  %v107_v53 = vld [vmem:[#allocation2 + $0x28] sm:$0xff] }
  0x12   :  { %729 = vmatprep.subr.bf16.mxu0 %v817_v4  ;;  %798 = vmatprep.subr.bf16.mxu1 %v817_v4  ;;  %v115_v54 = vld [vmem:[#allocation2 + $0x68] sm:$0xff] }
  0x15   :  { %730 = vmatpush3.bf16.msra.mxu0 %v817_v4  ;;  %806 = vmatpush3.bf16.msra.mxu1 %v817_v4 }
  0x16   :  { %731 = vmatprep.subr.bf16.mxu0 %v818_v7  ;;  %799 = vmatprep.subr.bf16.mxu1 %v818_v7 }
  0x19   :  { %732 = vmatpush3.bf16.msra.mxu0 %v818_v7  ;;  %807 = vmatpush3.bf16.msra.mxu1 %v818_v7 }
  0x1a   :  { %733 = vmatprep.subr.bf16.mxu0 %v819_v8  ;;  %800 = vmatprep.subr.bf16.mxu1 %v819_v8 }
  0x1d   :  { %734 = vmatpush3.bf16.msra.mxu0 %v819_v8  ;;  %808 = vmatpush3.bf16.msra.mxu1 %v819_v8 }
  0x1e   :  { %735 = vmatprep.subr.bf16.mxu0 %v820_v9  ;;  %801 = vmatprep.subr.bf16.mxu1 %v820_v9 }
  0x21   :  { %736 = vmatpush3.bf16.msra.mxu0 %v820_v9  ;;  %809 = vmatpush3.bf16.msra.mxu1 %v820_v9 }
  0x22   :  { %737 = vmatprep.subr.bf16.mxu0 %v821_v10  ;;  %802 = vmatprep.subr.bf16.mxu1 %v821_v10 }
  0x25   :  { %738 = vmatpush3.bf16.msra.mxu0 %v821_v10  ;;  %810 = vmatpush3.bf16.msra.mxu1 %v821_v10 }
  0x28   :  { %740 = vmatmul.mubr.bf16.vlgmr.msra.gmra.mrb[0].mxu0 %v824_v11  ;;  %748 = vmatmul.mubr.bf16.vlgmr.msra.gmra.mrb[0].mxu1 %v825_v12 }
  0x29   :  { %743 = vmatprep.mubr.bf16.mxu0 %v826_v13  ;;  %751 = vmatprep.mubr.bf16.mxu1 %v827_v14 }
  0x30   :  { %744 = vmatmul.mubr.bf16.gmra.mrb[4].mxu0 %v828_v15  ;;  %752 = vmatmul.mubr.bf16.gmra.mrb[4].mxu1 %v829_v16 }
  0xfb   :  { %v741_v21 = vpop.f32.mrb[0].mxu0  ;;  %v749_v22 = vpop.f32.mrb[0].mxu1 }
  0xfc   :  { %v345_v25 = vadd.f32 %v741_v21, %v104_v17  ;;  %v353_v26 = vadd.f32 %v749_v22, %v112_v18  ;;  %v280_v27 = vpop.f32.mrb[1].mxu0  ;;  %v312_v28 = vpop.f32.mrb[1].mxu1 }
  0xfd   :  { %v343_v31 = vadd.f32 %v280_v27, %v102_v19  ;;  %v351_v32 = vadd.f32 %v312_v28, %v110_v20  ;;  %v742_v33 = vpop.f32.mrb[2].mxu0  ;;  %v750_v34 = vpop.f32.mrb[2].mxu1 }
  0xfe   :  { %362 = vst.msk [vmem:[#allocation2 + $0x10] sm:$0xff] %vm79_vm0, %v345_v25  ;;  %370 = vst.msk [vmem:[#allocation2 + $0x50] sm:$0xff] %vm79_vm0, %v353_v26  ;;  %v346_v35 = vadd.f32 %v742_v33, %v105_v23  ;;  %v354_v36 = vadd.f32 %v750_v34, %v113_v24  ;;  %v283_v37 = vpop.f32.mrb[3].mxu0  ;;  %v315_v38 = vpop.f32.mrb[3].mxu1 }
  0xff   :  { %360 = vst.msk [vmem:[#allocation2] sm:$0xff] %vm79_vm0, %v343_v31  ;;  %368 = vst.msk [vmem:[#allocation2 + $0x40] sm:$0xff] %vm79_vm0, %v351_v32  ;;  %v344_v39 = vadd.f32 %v283_v37, %v103_v29  ;;  %v352_v40 = vadd.f32 %v315_v38, %v111_v30 }
 0x100   :  { %363 = vst.msk [vmem:[#allocation2 + $0x18] sm:$0xff] %vm79_vm0, %v346_v35  ;;  %371 = vst.msk [vmem:[#allocation2 + $0x58] sm:$0xff] %vm79_vm0, %v354_v36 }
 0x101   :  { %361 = vst.msk [vmem:[#allocation2 + $0x8] sm:$0xff] %vm79_vm0, %v344_v39  ;;  %369 = vst.msk [vmem:[#allocation2 + $0x48] sm:$0xff] %vm79_vm0, %v352_v40 }
 0x103   :  { %v745_v45 = vpop.f32.mrb[4].mxu0  ;;  %v753_v46 = vpop.f32.mrb[4].mxu1 }
 0x104   :  { %v349_v49 = vadd.f32 %v745_v45, %v108_v41  ;;  %v357_v50 = vadd.f32 %v753_v46, %v116_v42  ;;  %v296_v51 = vpop.f32.mrb[5].mxu0  ;;  %v328_v52 = vpop.f32.mrb[5].mxu1 }
 0x105   :  { %v347_v55 = vadd.f32 %v296_v51, %v106_v43  ;;  %v355_v56 = vadd.f32 %v328_v52, %v114_v44  ;;  %v746_v57 = vpop.f32.mrb[6].mxu0  ;;  %v754_v58 = vpop.f32.mrb[6].mxu1 }
 0x106   :  { %366 = vst.msk [vmem:[#allocation2 + $0x30] sm:$0xff] %vm79_vm0, %v349_v49  ;;  %374 = vst.msk [vmem:[#allocation2 + $0x70] sm:$0xff] %vm79_vm0, %v357_v50  ;;  %v350_v59 = vadd.f32 %v746_v57, %v109_v47  ;;  %v358_v60 = vadd.f32 %v754_v58, %v117_v48  ;;  %v299_v61 = vpop.f32.mrb[7].mxu0  ;;  %v331_v62 = vpop.f32.mrb[7].mxu1 }
 0x107   :  { %364 = vst.msk [vmem:[#allocation2 + $0x20] sm:$0xff] %vm79_vm0, %v347_v55  ;;  %372 = vst.msk [vmem:[#allocation2 + $0x60] sm:$0xff] %vm79_vm0, %v355_v56  ;;  %v348_v63 = vadd.f32 %v299_v61, %v107_v53  ;;  %v356_v1 = vadd.f32 %v331_v62, %v115_v54 }
 0x108   :  { %367 = vst.msk [vmem:[#allocation2 + $0x38] sm:$0xff] %vm79_vm0, %v350_v59  ;;  %375 = vst.msk [vmem:[#allocation2 + $0x78] sm:$0xff] %vm79_vm0, %v358_v60 }
 0x109   :  { %365 = vst.msk [vmem:[#allocation2 + $0x28] sm:$0xff] %vm79_vm0, %v348_v63  ;;  %373 = vst.msk [vmem:[#allocation2 + $0x68] sm:$0xff] %vm79_vm0, %v356_v1 }
 0x10a PF:  { %v830_v2 = vld [vmem:[%s1042_s6] sm:$0xff]   ;;  %775 = vmatprep.subr.bf16.mxu1 %v856_v0  ;;  %v831_v3 = vld [vmem:[%s1042_s6 + $0x8] sm:$0xff]   ;;  %v381_v9 = vld [vmem:[#allocation2 + $0x10] sm:$0xff]  ;;  %vm857_vm1 = vmmov 0   ;;  %s858_s23 = smov [#allocation6]   ;;  %vm629_vm2 = vcmask 519168  }
 0x10b   :  { %755 = vmatprep.subr.bf16.mxu0 %v830_v2  ;;  %v379_v4 = vld [vmem:[#allocation2] sm:$0xff]  ;;  %v380_v5 = vld [vmem:[#allocation2 + $0x8] sm:$0xff]  ;;  %v382_v10 = vld [vmem:[#allocation2 + $0x18] sm:$0xff]  ;;  %791 = vmatprep.mubr.msk.bf16.mxu1 %vm857_vm1, %v856_v0  ;;  %s637_s24 = sshll.u32 %s858_s23, 4  ;;  %s638_s24 = int_to_ptr.vmem [resolvable:$true] %s637_s24 }
 0x10c   :  { %v677_v6 = vld [vmem:[%s1041_s5] ss:$0 sm:$0xff]  ;;  %756 = vmatpush3.bf16.msra.mxu0 %v830_v2  ;;  %v388_v23 = vld [vmem:[#allocation2 + $0x48] sm:$0xff]  ;;  %v389_v38 = vld [vmem:[#allocation2 + $0x50] sm:$0xff]  ;;  %s832_s25 = scalar_lea.vmem %s638_s24, 64  ;;  %p837_p4 = scmp.lt.s32.totalorder %s638_s24, %s638_s24 }
 0x10d   :  { %v402_v7 = vadd.f32 %v677_v6, %v379_v4  ;;  %v403_v8 = vadd.f32 %v677_v6, %v380_v5  ;;  %757 = vmatprep.subr.bf16.mxu0 %v831_v3  ;;  %v404_v12 = vadd.f32 %v677_v6, %v381_v9  ;;  %v405_v13 = vadd.f32 %v677_v6, %v382_v10  ;;  %v385_v16 = vld [vmem:[#allocation2 + $0x30] sm:$0xff]  ;;  %v387_v22 = vld [vmem:[#allocation2 + $0x40] sm:$0xff]  ;;  %v390_v39 = vld [vmem:[#allocation2 + $0x58] sm:$0xff]  ;;  %p833_p3 = scmp.ne.s32.totalorder %s638_s24, %s832_s25  ;;  %p838_p5 = scmp.lt.s32.totalorder %s832_s25, %s832_s25 }
 0x10e   :  { %v383_v11 = vld [vmem:[#allocation2 + $0x20] sm:$0xff]  ;;  %v408_v21 = vadd.f32 %v677_v6, %v385_v16  ;;  %v410_v30 = vadd.f32 %v677_v6, %v387_v22  ;;  %v411_v32 = vadd.f32 %v677_v6, %v388_v23  ;;  %v412_v43 = vadd.f32 %v677_v6, %v389_v38  ;;  %v393_v52 = vld [vmem:[#allocation2 + $0x70] sm:$0xff] }
 0x10f   :  { %v406_v15 = vadd.f32 %v677_v6, %v383_v11  ;;  %v386_v17 = vld [vmem:[#allocation2 + $0x38] sm:$0xff]  ;;  %v418_v18 = vmax.f32 %v402_v7, 0.0  ;;  %v419_v19 = vmax.f32 %v403_v8, 0.0  ;;  %v420_v24 = vmax.f32 %v404_v12, 0.0  ;;  %v391_v40 = vld [vmem:[#allocation2 + $0x60] sm:$0xff]  ;;  %p839_p6 = por %p838_p5, %p837_p4 }
 0x110   :  { %v384_v14 = vld [vmem:[#allocation2 + $0x28] sm:$0xff]  ;;  %v421_v25 = vmax.f32 %v405_v13, 0.0  ;;  %v409_v27 = vadd.f32 %v677_v6, %v386_v17  ;;  %758 = vmatpush3.bf16.msra.mxu0 %v831_v3  ;;  %v424_v34 = vmax.f32 %v408_v21, 0.0  ;;  %v426_v36 = vmax.f32 %v410_v30, 0.0  ;;  %v394_v53 = vld [vmem:[#allocation2 + $0x78] sm:$0xff] }
 0x111   :  { %v407_v20 = vadd.f32 %v677_v6, %v384_v14  ;;  %v422_v26 = vmax.f32 %v406_v15, 0.0  ;;  %v434_v28 = vpack.c.bf16 %v419_v19, %v418_v18  ;;  %v427_v37 = vmax.f32 %v411_v32, 0.0  ;;  %v392_v41 = vld [vmem:[#allocation2 + $0x68] sm:$0xff]  ;;  %v580_v22 = vld [vmem:[%s1040_s4] sm:$0x3]  ;;  %p840_p7 = pnand %p839_p6, %p833_p3 }
 0x112   :  { %v435_v31 = vpack.c.bf16 %v421_v25, %v420_v24  ;;  %v425_v35 = vmax.f32 %v409_v27, 0.0  ;;  %v413_v44 = vadd.f32 %v677_v6, %v390_v39  ;;  %v414_v46 = vadd.f32 %v677_v6, %v391_v40 }
 0x113   :  { %v423_v29 = vmax.f32 %v407_v20, 0.0  ;;  %759 = vmatprep.mubr.msk.bf16.mxu0 %vm79_vm0, %v434_v28  ;;  %v438_v45 = vpack.c.bf16 %v427_v37, %v426_v36  ;;  %v415_v47 = vadd.f32 %v677_v6, %v392_v41  ;;  %v428_v48 = vmax.f32 %v412_v43, 0.0 }
 0x114   :  { %760 = vmatmul.mubr.msk.bf16.vlgmr.msra.gmra.mrb[0].mxu0 %vm79_vm0, %v435_v31  ;;  %v437_v42 = vpack.c.bf16 %v425_v35, %v424_v34  ;;  %v429_v49 = vmax.f32 %v413_v44, 0.0  ;;  %v430_v50 = vmax.f32 %v414_v46, 0.0  ;;  %v416_v55 = vadd.f32 %v677_v6, %v393_v52 }
 0x115   :  { %v436_v33 = vpack.c.bf16 %v423_v29, %v422_v26  ;;  %v431_v51 = vmax.f32 %v415_v47, 0.0  ;;  %v417_v56 = vadd.f32 %v677_v6, %v394_v53 }
 0x116   :  { %v439_v54 = vpack.c.bf16 %v429_v49, %v428_v48  ;;  %v432_v58 = vmax.f32 %v416_v55, 0.0 }
 0x117   :  { %763 = vmatprep.mubr.msk.bf16.mxu0 %vm79_vm0, %v436_v33  ;;  %v440_v57 = vpack.c.bf16 %v431_v51, %v430_v50  ;;  %v433_v59 = vmax.f32 %v417_v56, 0.0 }
 0x119   :  { %v441_v60 = vpack.c.bf16 %v433_v59, %v432_v58 }
 0x11c   :  { %764 = vmatmul.mubr.msk.bf16.gmra.mrb[4].mxu0 %vm79_vm0, %v437_v42 }
 0x11d   :  { %767 = vmatprep.mubr.msk.bf16.mxu0 %vm79_vm0, %v438_v45 }
 0x124   :  { %768 = vmatmul.mubr.msk.bf16.gmra.mrb[8].mxu0 %vm79_vm0, %v439_v54 }
 0x125   :  { %771 = vmatprep.mubr.msk.bf16.mxu0 %vm79_vm0, %v440_v57 }
 0x12c   :  { %772 = vmatmul.mubr.msk.bf16.gmra.mrb[12].mxu0 %vm79_vm0, %v441_v60 }
 0x1e7   :  { %v761_v61 = vpop.f32.mrb[0].mxu0 }
 0x1e8   :  { %v517_v62 = vpop.f32.mrb[1].mxu0 }
 0x1e9   :  { %v762_v63 = vpop.f32.mrb[2].mxu0 }
 0x1ea   :  { %v582_v1 = vpack.c.bf16 %v762_v63, %v761_v61  ;;  %v520_v2 = vpop.f32.mrb[3].mxu0 }
 0x1eb   :  { %v581_v3 = vpack.c.bf16 %v520_v2, %v517_v62 }
 0x1ed   :  { %776 = vmatpush3.bf16.msra.mxu1 %v581_v3 }
 0x1ee   :  { %777 = vmatprep.subr.bf16.mxu1 %v856_v0 }
 0x1ef   :  { %v765_v4 = vpop.f32.mrb[4].mxu0 }
 0x1f0   :  { %v533_v5 = vpop.f32.mrb[5].mxu0 }
 0x1f1   :  { %v766_v6 = vpop.f32.mrb[6].mxu0  ;;  %778 = vmatpush3.bf16.msra.mxu1 %v582_v1 }
 0x1f2   :  { %v584_v7 = vpack.c.bf16 %v766_v6, %v765_v4  ;;  %v536_v8 = vpop.f32.mrb[7].mxu0  ;;  %779 = vmatprep.subr.bf16.mxu1 %v856_v0 }
 0x1f3   :  { %v583_v9 = vpack.c.bf16 %v536_v8, %v533_v5 }
 0x1f5   :  { %780 = vmatpush3.bf16.msra.mxu1 %v583_v9 }
 0x1f6   :  { %781 = vmatprep.subr.bf16.mxu1 %v856_v0 }
 0x1f7   :  { %v769_v10 = vpop.f32.mrb[8].mxu0 }
 0x1f8   :  { %v549_v11 = vpop.f32.mrb[9].mxu0 }
 0x1f9   :  { %v770_v12 = vpop.f32.mrb[10].mxu0  ;;  %782 = vmatpush3.bf16.msra.mxu1 %v584_v7 }
 0x1fa   :  { %v586_v13 = vpack.c.bf16 %v770_v12, %v769_v10  ;;  %v552_v14 = vpop.f32.mrb[11].mxu0  ;;  %783 = vmatprep.subr.bf16.mxu1 %v856_v0 }
 0x1fb   :  { %v585_v15 = vpack.c.bf16 %v552_v14, %v549_v11 }
 0x1fd   :  { %784 = vmatpush3.bf16.msra.mxu1 %v585_v15 }
 0x1fe   :  { %785 = vmatprep.subr.bf16.mxu1 %v856_v0 }
 0x1ff   :  { %v773_v16 = vpop.f32.mrb[12].mxu0 }
 0x200   :  { %v565_v17 = vpop.f32.mrb[13].mxu0 }
 0x201   :  { %v774_v18 = vpop.f32.mrb[14].mxu0  ;;  %786 = vmatpush3.bf16.msra.mxu1 %v586_v13 }
 0x202   :  { %v588_v19 = vpack.c.bf16 %v774_v18, %v773_v16  ;;  %v568_v20 = vpop.f32.mrb[15].mxu0  ;;  %787 = vmatprep.subr.bf16.mxu1 %v856_v0 }
 0x203   :  { %v587_v21 = vpack.c.bf16 %v568_v20, %v565_v17 }
 0x205   :  { %788 = vmatpush3.bf16.msra.mxu1 %v587_v21 }
 0x206   :  { %789 = vmatprep.subr.bf16.mxu1 %v856_v0 }
 0x209   :  { %790 = vmatpush3.bf16.msra.mxu1 %v588_v19 }
 0x20c   :  { %792 = vmatmul.mubr.bf16.vlgmr.msra.gmra.mrb[0].mxu1 %v580_v22 }
 0x2df   :  { %v623_v23 = vpop.f32.mrb[0].mxu1 }
 0x2e0   :  { %v793_v24 = vpop.f32.mrb[1].mxu1  ;;  %630 = vst.msk [vmem:[#allocation6] sm:$0xf] %vm629_vm2, %v623_v23 }
 0x2e1   :  { %v626_v25 = vpop.f32.mrb[2].mxu1 }
 0x2e2   :  { %843 = shalt.err (!%p840_p7)
}
 0x2e3   :  { %s844_s4 = scalar_lea.hbm %s1043_s7, 64 }
 0x2e4   :  { %p845_p8 = scmp.ne.s32.totalorder %s1043_s7, %s844_s4  ;;  %p848_p9 = scmp.lt.u32.totalorder %s844_s4, %s1043_s7 }
 0x2e6   :  { %p850_p10 = pnand %p848_p9, %p845_p8 }
 0x2e8   :  { %853 = shalt.err (!%p850_p10)
}
 0x2e9   :  { %640 = dma.vmem_to_hbm [thread:$0]  %s638_s24, 64, %s1043_s7, [#allocation7]   ;;  %v794_v0 = vpop.f32.mrb[3].mxu1 }
 0x2ea   :  { %854 = dma.done.wait [#allocation7], 64  }
 0x2eb   :  { %855 = vsyncadd [#allocation7], 4294967232 }
 0x2ec   :  { %644 = vsyncpa [#allocation7], 1 }

</bundles_post_ra>
